<compile_context>
chip_gen: v7x
topology: tpu7x:2x2x1
jax: 0.10.0
libtpu: 0.0.40
codegen_flags: <defaults>
</compile_context>

<pallas_src>
import functools

import jax
import jax.numpy as jnp
from jax.experimental import pallas as pl
from jax.experimental.pallas import tpu as pltpu


# ----------------------------------------------------------------------------
# helpers
# ----------------------------------------------------------------------------
def _round_up(x, m):
    return (x + m - 1) // m * m


def _pick_tm(m):
    if m >= 512:
        return 512
    if m >= 256:
        return 256
    return _round_up(max(m, 8), 8)


def _pick_tk(kp):
    # kp is always a multiple of 128
    if kp <= 1024:
        return kp
    for t in (512, 384, 256, 128):
        if kp % t == 0:
            return t
    return 128


def _pick_tn(np_):
    # np_ is always a multiple of 128; large tn reduces A re-reads for deep 1x1s
    for t in (1024, 512, 256, 128):
        if np_ % t == 0:
            return t
    return np_


_VMEM_LIMIT = 48 * 1024 * 1024  # safe on v5e/v6e (128 MiB) and v7x (64 MiB)


# ----------------------------------------------------------------------------
# fused matmul + BN affine + (residual) + (ReLU) Pallas kernel (M/N/K tiled)
# ----------------------------------------------------------------------------
def _mm_body(a_ref, b_ref, s_ref, c_ref, r_ref, o_ref, acc_ref, relu):
    k = pl.program_id(2)

    @pl.when(k == 0)
    def _():
        acc_ref[...] = jnp.zeros_like(acc_ref)

    acc_ref[...] += jnp.dot(a_ref[...], b_ref[...],
                            preferred_element_type=jnp.float32)

    @pl.when(k == pl.num_programs(2) - 1)
    def _():
        y = acc_ref[...] * s_ref[...] + c_ref[...]
        if r_ref is not None:
            y = y + r_ref[...].astype(jnp.float32)
        if relu:
            y = jnp.maximum(y, 0.0)
        o_ref[...] = y.astype(o_ref.dtype)


def _make_mm_kernel(relu, has_res):
    if has_res:
        def kernel(a_ref, b_ref, s_ref, c_ref, r_ref, o_ref, acc_ref):
            _mm_body(a_ref, b_ref, s_ref, c_ref, r_ref, o_ref, acc_ref, relu)
    else:
        def kernel(a_ref, b_ref, s_ref, c_ref, o_ref, acc_ref):
            _mm_body(a_ref, b_ref, s_ref, c_ref, None, o_ref, acc_ref, relu)
    return kernel


@functools.partial(jax.jit, static_argnames=("relu", "n_out"))
def matmul_bn_act(a, b, scale, bias, res, relu, n_out):
    """out = act(a @ b * scale + bias (+ res))
    a: (M, K) activations (any float dtype, cast to bf16)
    b: (Kp, Np) pre-padded bf16 weights; scale/bias: (1, Np) f32.
    Returns (M, n_out) bf16."""
    M, K = a.shape
    Kp, Np = b.shape

    tm = _pick_tm(M)
    Mp = _round_up(M, tm)
    tk = _pick_tk(Kp)
    tn = _pick_tn(Np)

    a_p = jnp.pad(a.astype(jnp.bfloat16), ((0, Mp - M), (0, Kp - K)))

    has_res = res is not None
    in_specs = [
        pl.BlockSpec((tm, tk), lambda i, j, k: (i, k)),
        pl.BlockSpec((tk, tn), lambda i, j, k: (k, j)),
        pl.BlockSpec((1, tn), lambda i, j, k: (0, j)),
        pl.BlockSpec((1, tn), lambda i, j, k: (0, j)),
    ]
    args = [a_p, b, scale, bias]
    if has_res:
        r_p = jnp.pad(res.astype(jnp.bfloat16),
                      ((0, Mp - M), (0, Np - res.shape[1])))
        in_specs.append(pl.BlockSpec((tm, tn), lambda i, j, k: (i, j)))
        args.append(r_p)

    out = pl.pallas_call(
        _make_mm_kernel(relu, has_res),
        out_shape=jax.ShapeDtypeStruct((Mp, Np), jnp.bfloat16),
        grid_spec=pltpu.PrefetchScalarGridSpec(
            num_scalar_prefetch=0,
            grid=(Mp // tm, Np // tn, Kp // tk),
            in_specs=in_specs,
            out_specs=pl.BlockSpec((tm, tn), lambda i, j, k: (i, j)),
            scratch_shapes=[pltpu.VMEM((tm, tn), jnp.float32)],
        ),
        compiler_params=pltpu.CompilerParams(
            dimension_semantics=("parallel", "parallel", "arbitrary"),
            vmem_limit_bytes=_VMEM_LIMIT),
    )(*args)

    if Mp != M or Np != n_out:
        out = out[:M, :n_out]
    return out


# ----------------------------------------------------------------------------
# MaxPool 3x3 / stride 2 / pad 1 : tiled window-max reduction Pallas kernel
# ----------------------------------------------------------------------------
def _maxpool_kernel(p_ref, o_ref):
    o_ref[...] = jnp.max(p_ref[...], axis=0)


@jax.jit
def maxpool_3x3_s2(x):  # x: (N, H, W, C) NHWC bf16
    N, H, W, C = x.shape
    k, s, pad = 3, 2, 1
    oh = (H + 2 * pad - k) // s + 1
    ow = (W + 2 * pad - k) // s + 1
    xp = jnp.pad(x, ((0, 0), (pad, pad), (pad, pad), (0, 0)),
                 constant_values=-jnp.inf)
    # TODO(synk): fold the 9 window taps into the grid/index_map (direct
    # pooled read of the padded slab) to avoid materializing the 9x window
    # stack in HBM.
    wins = []
    for di in range(k):
        for dj in range(k):
            wins.append(xp[:, di:di + (oh - 1) * s + 1:s,
                            dj:dj + (ow - 1) * s + 1:s, :])
    p = jnp.stack(wins, axis=0).reshape(k * k, N * oh * ow, C)

    R = N * oh * ow
    tr = min(512, _round_up(max(R, 8), 8))
    Rp = _round_up(R, tr)
    Cp = _round_up(C, 128)
    p = jnp.pad(p, ((0, 0), (0, Rp - R), (0, Cp - C)),
                constant_values=-jnp.inf)

    out = pl.pallas_call(
        _maxpool_kernel,
        out_shape=jax.ShapeDtypeStruct((Rp, Cp), x.dtype),
        grid=(Rp // tr,),
        in_specs=[pl.BlockSpec((k * k, tr, Cp), lambda i: (0, i, 0))],
        out_specs=pl.BlockSpec((tr, Cp), lambda i: (i, 0)),
        compiler_params=pltpu.CompilerParams(
            dimension_semantics=("parallel",),
            vmem_limit_bytes=_VMEM_LIMIT),
    )(p)
    return out[:R, :C].reshape(N, oh, ow, C)


# ----------------------------------------------------------------------------
# conv (im2col / reshape glue) + fused BN/ReLU/residual
# ----------------------------------------------------------------------------
def _im2col(x, kh, kw, stride, pad):
    # TODO(synk): for 3x3 convs, replace im2col with a tap-offset grid axis in
    # the matmul kernel (direct conv) to avoid the kh*kw HBM patch blowup.
    if pad > 0:
        x = jnp.pad(x, ((0, 0), (pad, pad), (pad, pad), (0, 0)))
    N, H, W, C = x.shape
    oh = (H - kh) // stride + 1
    ow = (W - kw) // stride + 1
    cols = []
    for di in range(kh):
        for dj in range(kw):
            cols.append(x[:, di:di + (oh - 1) * stride + 1:stride,
                           dj:dj + (ow - 1) * stride + 1:stride, :])
    patches = jnp.concatenate(cols, axis=-1)  # (N, oh, ow, kh*kw*C)
    return patches.reshape(N * oh * ow, kh * kw * C), (N, oh, ow)


def conv_bn(x, p, stride, pad, relu=True, residual=None):
    kh, kw, cin, cout = p["kh"], p["kw"], p["cin"], p["cout"]
    if kh == 1 and kw == 1:
        if stride > 1:
            x = x[:, ::stride, ::stride, :]
        n, oh, ow, _ = x.shape
        a = x.reshape(n * oh * ow, cin)
    else:
        a, (n, oh, ow) = _im2col(x, kh, kw, stride, pad)
    res2d = None
    if residual is not None:
        res2d = residual.reshape(n * oh * ow, cout)
    out = matmul_bn_act(a, p["b"], p["scale"], p["bias"], res2d,
                        relu=relu, n_out=cout)
    return out.reshape(n, oh, ow, cout)


# ----------------------------------------------------------------------------
# ResNet-50 backbone parameters (deterministic synthetic init, BN folded,
# weights pre-transposed + pre-padded to lane multiples, bf16) and forward
# ----------------------------------------------------------------------------
def _conv_bn_params(key, cout, cin, kh, kw):
    ks = jax.random.split(key, 5)
    fan_in = cin * kh * kw
    w = jax.random.normal(ks[0], (cout, cin, kh, kw), jnp.float32) * jnp.sqrt(2.0 / fan_in)
    gamma = 1.0 + 0.1 * jax.random.normal(ks[1], (cout,), jnp.float32)
    beta = 0.1 * jax.random.normal(ks[2], (cout,), jnp.float32)
    mean = 0.1 * jax.random.normal(ks[3], (cout,), jnp.float32)
    var = 1.0 + jax.random.uniform(ks[4], (cout,), jnp.float32)
    inv = gamma * jax.lax.rsqrt(var + 1e-5)          # BN folded to affine (eval mode)
    bias = beta - mean * inv

    K = kh * kw * cin
    Kp = _round_up(K, 128)
    Np = _round_up(cout, 128)
    # (cout, cin, kh, kw) [PyTorch] -> (kh*kw*cin, cout) matching im2col ordering
    b = jnp.transpose(w, (2, 3, 1, 0)).reshape(K, cout)
    b = jnp.pad(b, ((0, Kp - K), (0, Np - cout))).astype(jnp.bfloat16)
    scale = jnp.pad(inv.reshape(1, cout), ((0, 0), (0, Np - cout)))
    bias = jnp.pad(bias.reshape(1, cout), ((0, 0), (0, Np - cout)))
    return {"b": b, "scale": scale, "bias": bias,
            "cout": cout, "cin": cin, "kh": kh, "kw": kw}


def make_resnet50_params(key):
    params = {}
    key, k = jax.random.split(key)
    params["conv1"] = _conv_bn_params(k, 64, 3, 7, 7)
    layer_cfg = [(64, 3, 1), (128, 4, 2), (256, 6, 2), (512, 3, 2)]
    inplanes = 64
    layers = []
    for planes, nblocks, stride in layer_cfg:
        blocks = []
        for bi in range(nblocks):
            s = stride if bi == 0 else 1
            key, k1, k2, k3, k4 = jax.random.split(key, 5)
            block = {
                "conv1": _conv_bn_params(k1, planes, inplanes, 1, 1),
                "conv2": _conv_bn_params(k2, planes, planes, 3, 3),
                "conv3": _conv_bn_params(k3, planes * 4, planes, 1, 1),
                "stride": s,
            }
            if s != 1 or inplanes != planes * 4:
                block["downsample"] = _conv_bn_params(k4, planes * 4, inplanes, 1, 1)
            blocks.append(block)
            inplanes = planes * 4
        layers.append(blocks)
    params["layers"] = layers
    return params


def bottleneck_forward(x, block):
    s = block["stride"]
    out = conv_bn(x, block["conv1"], 1, 0, relu=True)
    out = conv_bn(out, block["conv2"], s, 1, relu=True)
    if "downsample" in block:
        identity = conv_bn(x, block["downsample"], s, 0, relu=False)
    else:
        identity = x
    # conv3: BN + residual add + ReLU fused in the matmul epilogue
    out = conv_bn(out, block["conv3"], 1, 0, relu=True, residual=identity)
    return out


def resnet_backbone_forward(x_nchw, params):
    # NCHW (PyTorch) -> NHWC (kernel layout), bf16 activations
    x = jnp.transpose(x_nchw, (0, 2, 3, 1)).astype(jnp.bfloat16)
    x = conv_bn(x, params["conv1"], 2, 3, relu=True)
    x = maxpool_3x3_s2(x)
    for blocks in params["layers"]:
        for block in blocks:
            x = bottleneck_forward(x, block)
    # NHWC -> NCHW, float32, to match PyTorch output: (N, 2048, H/32, W/32)
    return jnp.transpose(x, (0, 3, 1, 2)).astype(jnp.float32)


if __name__ == "__main__":
    key = jax.random.PRNGKey(0)
    pkey, xkey = jax.random.split(key)
    params = make_resnet50_params(pkey)

    # small but ResNet-50-consistent input: (N, 3, 32, 32) -> (N, 2048, 1, 1)
    x = jax.random.normal(xkey, (2, 3, 32, 32), jnp.float32)

    y = resnet_backbone_forward(x, params)
    y = jax.block_until_ready(y)

    assert y.shape == (2, 2048, 1, 1), y.shape
    assert bool(jnp.all(jnp.isfinite(y)))
    print("KERNEL_OK")
</pallas_src>

<mosaic_0001>
module attributes {stable_mosaic.version = 11 : i64} {
  func.func @kernel(%arg0: i32, %arg1: i32, %arg2: i32, %arg3: memref<512x256xbf16, #tpu.memory_space<vmem>>, %arg4: memref<256x128xbf16, #tpu.memory_space<vmem>>, %arg5: memref<1x128xf32, #tpu.memory_space<vmem>>, %arg6: memref<1x128xf32, #tpu.memory_space<vmem>>, %arg7: memref<512x128xbf16, #tpu.memory_space<vmem>>, %arg8: memref<512x128xf32, #tpu.memory_space<vmem>>) attributes {dimension_semantics = [#tpu.dimension_semantics<parallel>, #tpu.dimension_semantics<parallel>, #tpu.dimension_semantics<arbitrary>], iteration_bounds = array<i64: 1, 1, 1>, scalar_prefetch = 0 : i64, scratch_operands = 1 : i64, tpu.core_type = #tpu.core_type<tc>, window_params = [{transform_indices = @transform_0, window_bounds = array<i64: 512, 256>}, {transform_indices = @transform_1, window_bounds = array<i64: 256, 128>}, {transform_indices = @transform_2, window_bounds = array<i64: 1, 128>}, {transform_indices = @transform_3, window_bounds = array<i64: 1, 128>}, {transform_indices = @transform_4, window_bounds = array<i64: 512, 128>}]} {
    %c0_i32 = arith.constant 0 : i32
    %0 = arith.cmpi eq, %arg2, %c0_i32 : i32
    %1 = arith.extui %0 : i1 to i32
    %c0_i32_0 = arith.constant 0 : i32
    %2 = arith.cmpi ne, %1, %c0_i32_0 : i32
    scf.if %2 {
      %cst_10 = arith.constant 0.000000e+00 : f32
      %12 = vector.broadcast %cst_10 : f32 to vector<512x128xf32>
      %c0_11 = arith.constant 0 : index
      %c0_12 = arith.constant 0 : index
      %13 = vector.load %arg8[%c0_11, %c0_12] : memref<512x128xf32, #tpu.memory_space<vmem>>, vector<512x128xf32>
      tpu.vector_store %arg8[%c0_11, %c0_12], %12 {strides = array<i32>} : memref<512x128xf32, #tpu.memory_space<vmem>>, vector<512x128xf32>,
    } else {
    }
    %c0 = arith.constant 0 : index
    %c0_1 = arith.constant 0 : index
    %3 = vector.load %arg8[%c0, %c0_1] : memref<512x128xf32, #tpu.memory_space<vmem>>, vector<512x128xf32>
    %c0_2 = arith.constant 0 : index
    %c0_3 = arith.constant 0 : index
    %4 = vector.load %arg3[%c0_2, %c0_3] : memref<512x256xbf16, #tpu.memory_space<vmem>>, vector<512x256xbf16>
    %c0_4 = arith.constant 0 : index
    %c0_5 = arith.constant 0 : index
    %5 = vector.load %arg4[%c0_4, %c0_5] : memref<256x128xbf16, #tpu.memory_space<vmem>>, vector<256x128xbf16>
    %cst = arith.constant dense<0.000000e+00> : vector<512x128xf32>
    %6 = tpu.matmul %4, %5, %cst {dimension_numbers = #tpu.dot_dimension_numbers<[1], [0], [0], [1], [0, 0, 1, 1], [], []>} : vector<512x256xbf16>, vector<256x128xbf16>, vector<512x128xf32> -> vector<512x128xf32>
    %7 = arith.addf %3, %6 : vector<512x128xf32>
    %c0_6 = arith.constant 0 : index
    %c0_7 = arith.constant 0 : index
    %8 = vector.load %arg8[%c0_6, %c0_7] : memref<512x128xf32, #tpu.memory_space<vmem>>, vector<512x128xf32>
    tpu.vector_store %arg8[%c0_6, %c0_7], %7 {strides = array<i32>} : memref<512x128xf32, #tpu.memory_space<vmem>>, vector<512x128xf32>,
    %c0_i32_8 = arith.constant 0 : i32
    %9 = arith.cmpi eq, %arg2, %c0_i32_8 : i32
    %10 = arith.extui %9 : i1 to i32
    %c0_i32_9 = arith.constant 0 : i32
    %11 = arith.cmpi ne, %10, %c0_i32_9 : i32
    scf.if %11 {
      %c0_10 = arith.constant 0 : index
      %c0_11 = arith.constant 0 : index
      %12 = vector.load %arg8[%c0_10, %c0_11] : memref<512x128xf32, #tpu.memory_space<vmem>>, vector<512x128xf32>
      %c0_12 = arith.constant 0 : index
      %c0_13 = arith.constant 0 : index
      %13 = vector.load %arg5[%c0_12, %c0_13] : memref<1x128xf32, #tpu.memory_space<vmem>>, vector<1x128xf32>
      %14 = vector.broadcast %13 : vector<1x128xf32> to vector<512x128xf32>
      %15 = arith.mulf %12, %14 : vector<512x128xf32>
      %c0_14 = arith.constant 0 : index
      %c0_15 = arith.constant 0 : index
      %16 = vector.load %arg6[%c0_14, %c0_15] : memref<1x128xf32, #tpu.memory_space<vmem>>, vector<1x128xf32>
      %17 = vector.broadcast %16 : vector<1x128xf32> to vector<512x128xf32>
      %18 = arith.addf %15, %17 : vector<512x128xf32>
      %cst_16 = arith.constant 0.000000e+00 : f32
      %19 = vector.broadcast %cst_16 : f32 to vector<512x128xf32>
      %20 = arith.maximumf %18, %19 : vector<512x128xf32>
      %21 = arith.truncf %20 : vector<512x128xf32> to vector<512x128xbf16>
      %c0_17 = arith.constant 0 : index
      %c0_18 = arith.constant 0 : index
      %22 = vector.load %arg7[%c0_17, %c0_18] : memref<512x128xbf16, #tpu.memory_space<vmem>>, vector<512x128xbf16>
      tpu.vector_store %arg7[%c0_17, %c0_18], %21 {strides = array<i32>} : memref<512x128xbf16, #tpu.memory_space<vmem>>, vector<512x128xbf16>,
    } else {
    }
    return
  }
  func.func @transform_0(%arg0: i32, %arg1: i32, %arg2: i32) -> (i32, i32) {
    %c0_i32 = arith.constant 0 : i32
    return %arg0, %arg2 : i32, i32
  }
  func.func @transform_1(%arg0: i32, %arg1: i32, %arg2: i32) -> (i32, i32) {
    %c0_i32 = arith.constant 0 : i32
    return %arg2, %arg1 : i32, i32
  }
  func.func @transform_2(%arg0: i32, %arg1: i32, %arg2: i32) -> (i32, i32) {
    %c0_i32 = arith.constant 0 : i32
    %c0_i32_0 = arith.constant 0 : i32
    return %c0_i32, %arg1 : i32, i32
  }
  func.func @transform_3(%arg0: i32, %arg1: i32, %arg2: i32) -> (i32, i32) {
    %c0_i32 = arith.constant 0 : i32
    %c0_i32_0 = arith.constant 0 : i32
    return %c0_i32, %arg1 : i32, i32
  }
  func.func @transform_4(%arg0: i32, %arg1: i32, %arg2: i32) -> (i32, i32) {
    %c0_i32 = arith.constant 0 : i32
    return %arg0, %arg1 : i32, i32
  }
}

</mosaic_0001>

<bundles_post_ra>
// kernel: matmul_bn_act.1
= control target key start
LH: loop header
LB: loop body
LE: loop exit
PB: predicated region body
PF: predicated region fallthrough
CT: control target
= control target key end

     0   :  { %v2222_v0 = vmov 0   ;;  %s2754_s1 = inlined_call_operand.vmem [shape: bf16[256,128], index: 1, kind: input, shape index: {}]   ;;  %s2755_s0 = inlined_call_operand.vmem [shape: bf16[512,256], index: 0, kind: input, shape index: {}]   ;;  %s2756_s2 = inlined_call_operand.vmem [shape: f32[1,128], index: 2, kind: input, shape index: {}]   ;;  %s2757_s3 = inlined_call_operand.vmem [shape: f32[1,128], index: 3, kind: input, shape index: {}]   ;;  %s2758_s4 = inlined_call_operand.vmem [shape: bf16[512,128], index: 4, kind: output, shape index: {}]  }
   0x1   :  { %662 = vmatprep.subr.bf16.mxu0 %v2222_v0  ;;  %2077 = vmatprep.subr.bf16.mxu1 %v2222_v0  ;;  %v2110_v1 = vld [vmem:[%s2754_s1] sm:$0xff]   ;;  %v2111_v2 = vld [vmem:[%s2754_s1 + $0x8] sm:$0xff]   ;;  %v2112_v3 = vld [vmem:[%s2754_s1 + $0x10] sm:$0xff]  }
   0x2   :  { %663 = vmatpush1.bf16.msra.mxu0 %v2110_v1  ;;  %2093 = vmatpush1.bf16.msra.mxu1 %v2110_v1  ;;  %v2113_v4 = vld [vmem:[%s2754_s1 + $0x18] sm:$0xff]   ;;  %v2114_v5 = vld [vmem:[%s2754_s1 + $0x20] sm:$0xff]   ;;  %v2115_v7 = vld [vmem:[%s2754_s1 + $0x28] sm:$0xff]  }
   0x3   :  { %664 = vmatprep.subr.bf16.mxu0 %v2222_v0  ;;  %2078 = vmatprep.subr.bf16.mxu1 %v2222_v0  ;;  %v2128_v6 = vld [vmem:[%s2755_s0 + $0x4] ss:$8 sps:$4 sm:$0xff]   ;;  %v2116_v9 = vld [vmem:[%s2754_s1 + $0x30] sm:$0xff]   ;;  %v2117_v10 = vld [vmem:[%s2754_s1 + $0x38] sm:$0xff]  }
   0x4   :  { %v2131_v8 = vld [vmem:[%s2755_s0 + $0x104] ss:$8 sps:$4 sm:$0xff]   ;;  %694 = vmatprep.mubr.bf16.mxu0 %v2128_v6  ;;  %v2120_v13 = vld [vmem:[%s2754_s1 + $0x50] sm:$0xff]   ;;  %v2121_v14 = vld [vmem:[%s2754_s1 + $0x58] sm:$0xff]  }
   0x5   :  { %822 = vmatprep.mubr.bf16.mxu1 %v2131_v8  ;;  %v2118_v11 = vld [vmem:[%s2754_s1 + $0x40] sm:$0xff]   ;;  %v2119_v12 = vld [vmem:[%s2754_s1 + $0x48] sm:$0xff]   ;;  %v2124_v17 = vld [vmem:[%s2754_s1 + $0x70] sm:$0xff]  }
   0x6   :  { %665 = vmatpush1.bf16.msra.mxu0 %v2111_v2  ;;  %2094 = vmatpush1.bf16.msra.mxu1 %v2111_v2  ;;  %v2122_v15 = vld [vmem:[%s2754_s1 + $0x60] sm:$0xff]   ;;  %v2123_v16 = vld [vmem:[%s2754_s1 + $0x68] sm:$0xff]   ;;  %v2125_v18 = vld [vmem:[%s2754_s1 + $0x78] sm:$0xff]  }
   0x7   :  { %666 = vmatprep.subr.bf16.mxu0 %v2222_v0  ;;  %2079 = vmatprep.subr.bf16.mxu1 %v2222_v0  ;;  %v2126_v19 = vld [vmem:[%s2755_s0] ss:$8 sps:$4 sm:$0xff]   ;;  %v2132_v21 = vld [vmem:[%s2755_s0 + $0x14] ss:$8 sps:$4 sm:$0xff]   ;;  %v2136_v23 = vld [vmem:[%s2755_s0 + $0x10] ss:$8 sps:$4 sm:$0xff]  }
   0x8   :  { %v2129_v20 = vld [vmem:[%s2755_s0 + $0x100] ss:$8 sps:$4 sm:$0xff]   ;;  %v2134_v22 = vld [vmem:[%s2755_s0 + $0x114] ss:$8 sps:$4 sm:$0xff]   ;;  %v2137_v24 = vld [vmem:[%s2755_s0 + $0x110] ss:$8 sps:$4 sm:$0xff]  }
   0x9   :  { %v2138_v25 = vld [vmem:[%s2755_s0 + $0x24] ss:$8 sps:$4 sm:$0xff]   ;;  %v2142_v27 = vld [vmem:[%s2755_s0 + $0x20] ss:$8 sps:$4 sm:$0xff]   ;;  %v2144_v29 = vld [vmem:[%s2755_s0 + $0x34] ss:$8 sps:$4 sm:$0xff]  }
   0xa   :  { %667 = vmatpush1.bf16.msra.mxu0 %v2112_v3  ;;  %2095 = vmatpush1.bf16.msra.mxu1 %v2112_v3  ;;  %v2140_v26 = vld [vmem:[%s2755_s0 + $0x124] ss:$8 sps:$4 sm:$0xff]   ;;  %v2143_v28 = vld [vmem:[%s2755_s0 + $0x120] ss:$8 sps:$4 sm:$0xff]   ;;  %v2146_v30 = vld [vmem:[%s2755_s0 + $0x134] ss:$8 sps:$4 sm:$0xff]  }
   0xb   :  { %668 = vmatprep.subr.bf16.mxu0 %v2222_v0  ;;  %2080 = vmatprep.subr.bf16.mxu1 %v2222_v0  ;;  %v2148_v31 = vld [vmem:[%s2755_s0 + $0x30] ss:$8 sps:$4 sm:$0xff]   ;;  %v2150_v33 = vld [vmem:[%s2755_s0 + $0x44] ss:$8 sps:$4 sm:$0xff]   ;;  %v2154_v35 = vld [vmem:[%s2755_s0 + $0x40] ss:$8 sps:$4 sm:$0xff]  }
   0xc   :  { %v2149_v32 = vld [vmem:[%s2755_s0 + $0x130] ss:$8 sps:$4 sm:$0xff]   ;;  %v2152_v34 = vld [vmem:[%s2755_s0 + $0x144] ss:$8 sps:$4 sm:$0xff]   ;;  %v2155_v36 = vld [vmem:[%s2755_s0 + $0x140] ss:$8 sps:$4 sm:$0xff]  }
   0xd   :  { %v2156_v37 = vld [vmem:[%s2755_s0 + $0x54] ss:$8 sps:$4 sm:$0xff]   ;;  %v2160_v39 = vld [vmem:[%s2755_s0 + $0x50] ss:$8 sps:$4 sm:$0xff]   ;;  %v2162_v41 = vld [vmem:[%s2755_s0 + $0x64] ss:$8 sps:$4 sm:$0xff]  }
   0xe   :  { %669 = vmatpush1.bf16.msra.mxu0 %v2113_v4  ;;  %2096 = vmatpush1.bf16.msra.mxu1 %v2113_v4  ;;  %v2158_v38 = vld [vmem:[%s2755_s0 + $0x154] ss:$8 sps:$4 sm:$0xff]   ;;  %v2161_v40 = vld [vmem:[%s2755_s0 + $0x150] ss:$8 sps:$4 sm:$0xff]   ;;  %v2164_v42 = vld [vmem:[%s2755_s0 + $0x164] ss:$8 sps:$4 sm:$0xff]  }
   0xf   :  { %670 = vmatprep.subr.bf16.mxu0 %v2222_v0  ;;  %2081 = vmatprep.subr.bf16.mxu1 %v2222_v0  ;;  %v2166_v43 = vld [vmem:[%s2755_s0 + $0x60] ss:$8 sps:$4 sm:$0xff]   ;;  %v2168_v45 = vld [vmem:[%s2755_s0 + $0x74] ss:$8 sps:$4 sm:$0xff]   ;;  %v2172_v47 = vld [vmem:[%s2755_s0 + $0x70] ss:$8 sps:$4 sm:$0xff]  }
  0x10   :  { %v2167_v44 = vld [vmem:[%s2755_s0 + $0x160] ss:$8 sps:$4 sm:$0xff]   ;;  %v2170_v46 = vld [vmem:[%s2755_s0 + $0x174] ss:$8 sps:$4 sm:$0xff]   ;;  %v2173_v48 = vld [vmem:[%s2755_s0 + $0x170] ss:$8 sps:$4 sm:$0xff]  }
  0x11   :  { %v2174_v49 = vld [vmem:[%s2755_s0 + $0x84] ss:$8 sps:$4 sm:$0xff]   ;;  %v2178_v51 = vld [vmem:[%s2755_s0 + $0x80] ss:$8 sps:$4 sm:$0xff]   ;;  %v2180_v53 = vld [vmem:[%s2755_s0 + $0x94] ss:$8 sps:$4 sm:$0xff]  }
  0x12   :  { %671 = vmatpush1.bf16.msra.mxu0 %v2114_v5  ;;  %2097 = vmatpush1.bf16.msra.mxu1 %v2114_v5  ;;  %v2176_v50 = vld [vmem:[%s2755_s0 + $0x184] ss:$8 sps:$4 sm:$0xff]   ;;  %v2179_v52 = vld [vmem:[%s2755_s0 + $0x180] ss:$8 sps:$4 sm:$0xff]   ;;  %v2182_v54 = vld [vmem:[%s2755_s0 + $0x194] ss:$8 sps:$4 sm:$0xff]  }
  0x13   :  { %672 = vmatprep.subr.bf16.mxu0 %v2222_v0  ;;  %2082 = vmatprep.subr.bf16.mxu1 %v2222_v0  ;;  %v2184_v55 = vld [vmem:[%s2755_s0 + $0x90] ss:$8 sps:$4 sm:$0xff]   ;;  %v2186_v57 = vld [vmem:[%s2755_s0 + $0xa4] ss:$8 sps:$4 sm:$0xff]   ;;  %v2190_v59 = vld [vmem:[%s2755_s0 + $0xa0] ss:$8 sps:$4 sm:$0xff]  }
  0x14   :  { %v2185_v56 = vld [vmem:[%s2755_s0 + $0x190] ss:$8 sps:$4 sm:$0xff]   ;;  %v2188_v58 = vld [vmem:[%s2755_s0 + $0x1a4] ss:$8 sps:$4 sm:$0xff]   ;;  %v2191_v60 = vld [vmem:[%s2755_s0 + $0x1a0] ss:$8 sps:$4 sm:$0xff]  }
  0x15   :  { %v2192_v61 = vld [vmem:[%s2755_s0 + $0xb4] ss:$8 sps:$4 sm:$0xff]   ;;  %v2196_v63 = vld [vmem:[%s2755_s0 + $0xb0] ss:$8 sps:$4 sm:$0xff]   ;;  %v2198_v1 = vld [vmem:[%s2755_s0 + $0xc4] ss:$8 sps:$4 sm:$0xff]  }
  0x16   :  { %673 = vmatpush1.bf16.msra.mxu0 %v2115_v7  ;;  %2098 = vmatpush1.bf16.msra.mxu1 %v2115_v7  ;;  %v2194_v62 = vld [vmem:[%s2755_s0 + $0x1b4] ss:$8 sps:$4 sm:$0xff]   ;;  %v2200_v2 = vld [vmem:[%s2755_s0 + $0x1c4] ss:$8 sps:$4 sm:$0xff]   ;;  %v2202_v3 = vld [vmem:[%s2755_s0 + $0xc0] ss:$8 sps:$4 sm:$0xff]  }
  0x17   :  { %674 = vmatprep.subr.bf16.mxu0 %v2222_v0  ;;  %2083 = vmatprep.subr.bf16.mxu1 %v2222_v0  ;;  %v2203_v4 = vld [vmem:[%s2755_s0 + $0x1c0] ss:$8 sps:$4 sm:$0xff]   ;;  %v2204_v5 = vld [vmem:[%s2755_s0 + $0xd4] ss:$8 sps:$4 sm:$0xff]   ;;  %v2208_v7 = vld [vmem:[%s2755_s0 + $0xd0] ss:$8 sps:$4 sm:$0xff]  }
  0x18   :  { %v2206_v6 = vld [vmem:[%s2755_s0 + $0x1d4] ss:$8 sps:$4 sm:$0xff]   ;;  %v2209_v8 = vld [vmem:[%s2755_s0 + $0x1d0] ss:$8 sps:$4 sm:$0xff]  }
  0x1a   :  { %675 = vmatpush1.bf16.msra.mxu0 %v2116_v9  ;;  %2099 = vmatpush1.bf16.msra.mxu1 %v2116_v9  ;;  %v2210_v9 = vld [vmem:[%s2755_s0 + $0xe4] ss:$8 sps:$4 sm:$0xff]  }
  0x1b   :  { %676 = vmatprep.subr.bf16.mxu0 %v2222_v0  ;;  %2084 = vmatprep.subr.bf16.mxu1 %v2222_v0 }
  0x1e   :  { %677 = vmatpush1.bf16.msra.mxu0 %v2117_v10  ;;  %2100 = vmatpush1.bf16.msra.mxu1 %v2117_v10  ;;  %v2212_v10 = vld [vmem:[%s2755_s0 + $0x1e4] ss:$8 sps:$4 sm:$0xff]  }
  0x1f   :  { %678 = vmatprep.subr.bf16.mxu0 %v2222_v0  ;;  %2085 = vmatprep.subr.bf16.mxu1 %v2222_v0 }
  0x22   :  { %679 = vmatpush1.bf16.msra.mxu0 %v2118_v11  ;;  %2101 = vmatpush1.bf16.msra.mxu1 %v2118_v11  ;;  %v2214_v11 = vld [vmem:[%s2755_s0 + $0xe0] ss:$8 sps:$4 sm:$0xff]  }
  0x23   :  { %680 = vmatprep.subr.bf16.mxu0 %v2222_v0  ;;  %2086 = vmatprep.subr.bf16.mxu1 %v2222_v0 }
  0x26   :  { %681 = vmatpush1.bf16.msra.mxu0 %v2119_v12  ;;  %2102 = vmatpush1.bf16.msra.mxu1 %v2119_v12  ;;  %v2215_v12 = vld [vmem:[%s2755_s0 + $0x1e0] ss:$8 sps:$4 sm:$0xff]  }
  0x27   :  { %682 = vmatprep.subr.bf16.mxu0 %v2222_v0  ;;  %2087 = vmatprep.subr.bf16.mxu1 %v2222_v0 }
  0x2a   :  { %683 = vmatpush1.bf16.msra.mxu0 %v2120_v13  ;;  %2103 = vmatpush1.bf16.msra.mxu1 %v2120_v13  ;;  %v2216_v13 = vld [vmem:[%s2755_s0 + $0xf4] ss:$8 sps:$4 sm:$0xff]  }
  0x2b   :  { %684 = vmatprep.subr.bf16.mxu0 %v2222_v0  ;;  %2088 = vmatprep.subr.bf16.mxu1 %v2222_v0 }
  0x2e   :  { %685 = vmatpush1.bf16.msra.mxu0 %v2121_v14  ;;  %2104 = vmatpush1.bf16.msra.mxu1 %v2121_v14  ;;  %v2218_v14 = vld [vmem:[%s2755_s0 + $0x1f4] ss:$8 sps:$4 sm:$0xff]  }
  0x2f   :  { %686 = vmatprep.subr.bf16.mxu0 %v2222_v0  ;;  %2089 = vmatprep.subr.bf16.mxu1 %v2222_v0 }
  0x32   :  { %687 = vmatpush1.bf16.msra.mxu0 %v2122_v15  ;;  %2105 = vmatpush1.bf16.msra.mxu1 %v2122_v15  ;;  %v2220_v15 = vld [vmem:[%s2755_s0 + $0xf0] ss:$8 sps:$4 sm:$0xff]  }
  0x33   :  { %688 = vmatprep.subr.bf16.mxu0 %v2222_v0  ;;  %2090 = vmatprep.subr.bf16.mxu1 %v2222_v0 }
  0x36   :  { %689 = vmatpush1.bf16.msra.mxu0 %v2123_v16  ;;  %2106 = vmatpush1.bf16.msra.mxu1 %v2123_v16  ;;  %v2221_v16 = vld [vmem:[%s2755_s0 + $0x1f0] ss:$8 sps:$4 sm:$0xff]  }
  0x37   :  { %690 = vmatprep.subr.bf16.mxu0 %v2222_v0  ;;  %2091 = vmatprep.subr.bf16.mxu1 %v2222_v0 }
  0x3a   :  { %691 = vmatpush1.bf16.msra.mxu0 %v2124_v17  ;;  %2107 = vmatpush1.bf16.msra.mxu1 %v2124_v17  ;;  %v2523_v17 = vld [vmem:[%s2756_s2] ss:$0 sm:$0xff] }
  0x3b   :  { %692 = vmatprep.subr.bf16.mxu0 %v2222_v0  ;;  %2092 = vmatprep.subr.bf16.mxu1 %v2222_v0  ;;  %v2197_v0 = vld [vmem:[%s2755_s0 + $0x1b0] ss:$8 sps:$4 sm:$0xff]  }
  0x3e   :  { %693 = vmatpush1.bf16.msra.mxu0 %v2125_v18  ;;  %2108 = vmatpush1.bf16.msra.mxu1 %v2125_v18 }
  0x41   :  { %695 = vmatmul.mubr.bf16.vlgmr.msra.gmra.mrb[0].mxu0 %v2126_v19  ;;  %823 = vmatmul.mubr.bf16.vlgmr.msra.gmra.mrb[0].mxu1 %v2129_v20  ;;  %v2528_v19 = vld [vmem:[%s2757_s3] ss:$0 sm:$0xff] }
  0x42   :  { %702 = vmatprep.mubr.bf16.mxu0 %v2132_v21  ;;  %830 = vmatprep.mubr.bf16.mxu1 %v2134_v22 }
  0x49   :  { %703 = vmatmul.mubr.bf16.gmra.mrb[4].mxu0 %v2136_v23  ;;  %831 = vmatmul.mubr.bf16.gmra.mrb[4].mxu1 %v2137_v24 }
  0x4a   :  { %710 = vmatprep.mubr.bf16.mxu0 %v2138_v25  ;;  %838 = vmatprep.mubr.bf16.mxu1 %v2140_v26 }
  0x51   :  { %711 = vmatmul.mubr.bf16.gmra.mrb[8].mxu0 %v2142_v27  ;;  %839 = vmatmul.mubr.bf16.gmra.mrb[8].mxu1 %v2143_v28 }
  0x52   :  { %718 = vmatprep.mubr.bf16.mxu0 %v2144_v29  ;;  %846 = vmatprep.mubr.bf16.mxu1 %v2146_v30 }
  0x59   :  { %719 = vmatmul.mubr.bf16.gmra.mrb[12].mxu0 %v2148_v31  ;;  %847 = vmatmul.mubr.bf16.gmra.mrb[12].mxu1 %v2149_v32 }
  0x5a   :  { %726 = vmatprep.mubr.bf16.mxu0 %v2150_v33  ;;  %854 = vmatprep.mubr.bf16.mxu1 %v2152_v34 }
  0x61   :  { %727 = vmatmul.mubr.bf16.gmra.mrb[16].mxu0 %v2154_v35  ;;  %855 = vmatmul.mubr.bf16.gmra.mrb[16].mxu1 %v2155_v36 }
  0x62   :  { %734 = vmatprep.mubr.bf16.mxu0 %v2156_v37  ;;  %862 = vmatprep.mubr.bf16.mxu1 %v2158_v38 }
  0x69   :  { %735 = vmatmul.mubr.bf16.gmra.mrb[20].mxu0 %v2160_v39  ;;  %863 = vmatmul.mubr.bf16.gmra.mrb[20].mxu1 %v2161_v40 }
  0x6a   :  { %742 = vmatprep.mubr.bf16.mxu0 %v2162_v41  ;;  %870 = vmatprep.mubr.bf16.mxu1 %v2164_v42 }
  0x71   :  { %743 = vmatmul.mubr.bf16.gmra.mrb[24].mxu0 %v2166_v43  ;;  %871 = vmatmul.mubr.bf16.gmra.mrb[24].mxu1 %v2167_v44 }
  0x72   :  { %750 = vmatprep.mubr.bf16.mxu0 %v2168_v45  ;;  %878 = vmatprep.mubr.bf16.mxu1 %v2170_v46 }
  0x79   :  { %751 = vmatmul.mubr.bf16.gmra.mrb[28].mxu0 %v2172_v47  ;;  %879 = vmatmul.mubr.bf16.gmra.mrb[28].mxu1 %v2173_v48 }
  0x7a   :  { %758 = vmatprep.mubr.bf16.mxu0 %v2174_v49  ;;  %886 = vmatprep.mubr.bf16.mxu1 %v2176_v50 }
  0x81   :  { %759 = vmatmul.mubr.bf16.gmra.mrb[32].mxu0 %v2178_v51  ;;  %887 = vmatmul.mubr.bf16.gmra.mrb[32].mxu1 %v2179_v52 }
  0x82   :  { %766 = vmatprep.mubr.bf16.mxu0 %v2180_v53  ;;  %894 = vmatprep.mubr.bf16.mxu1 %v2182_v54 }
  0x89   :  { %767 = vmatmul.mubr.bf16.gmra.mrb[36].mxu0 %v2184_v55  ;;  %895 = vmatmul.mubr.bf16.gmra.mrb[36].mxu1 %v2185_v56 }
  0x8a   :  { %774 = vmatprep.mubr.bf16.mxu0 %v2186_v57  ;;  %902 = vmatprep.mubr.bf16.mxu1 %v2188_v58 }
  0x91   :  { %775 = vmatmul.mubr.bf16.gmra.mrb[40].mxu0 %v2190_v59  ;;  %903 = vmatmul.mubr.bf16.gmra.mrb[40].mxu1 %v2191_v60 }
  0x92   :  { %782 = vmatprep.mubr.bf16.mxu0 %v2192_v61  ;;  %910 = vmatprep.mubr.bf16.mxu1 %v2194_v62 }
  0x99   :  { %783 = vmatmul.mubr.bf16.gmra.mrb[44].mxu0 %v2196_v63  ;;  %911 = vmatmul.mubr.bf16.gmra.mrb[44].mxu1 %v2197_v0 }
  0x9a   :  { %790 = vmatprep.mubr.bf16.mxu0 %v2198_v1  ;;  %918 = vmatprep.mubr.bf16.mxu1 %v2200_v2 }
  0xa1   :  { %791 = vmatmul.mubr.bf16.gmra.mrb[48].mxu0 %v2202_v3  ;;  %919 = vmatmul.mubr.bf16.gmra.mrb[48].mxu1 %v2203_v4 }
  0xa2   :  { %798 = vmatprep.mubr.bf16.mxu0 %v2204_v5  ;;  %926 = vmatprep.mubr.bf16.mxu1 %v2206_v6 }
  0xa9   :  { %799 = vmatmul.mubr.bf16.gmra.mrb[52].mxu0 %v2208_v7  ;;  %927 = vmatmul.mubr.bf16.gmra.mrb[52].mxu1 %v2209_v8 }
  0xaa   :  { %806 = vmatprep.mubr.bf16.mxu0 %v2210_v9  ;;  %934 = vmatprep.mubr.bf16.mxu1 %v2212_v10 }
  0xb1   :  { %807 = vmatmul.mubr.bf16.gmra.mrb[56].mxu0 %v2214_v11  ;;  %935 = vmatmul.mubr.bf16.gmra.mrb[56].mxu1 %v2215_v12 }
  0xb2   :  { %814 = vmatprep.mubr.bf16.mxu0 %v2216_v13  ;;  %942 = vmatprep.mubr.bf16.mxu1 %v2218_v14 }
  0xb9   :  { %815 = vmatmul.mubr.bf16.gmra.mrb[60].mxu0 %v2220_v15  ;;  %943 = vmatmul.mubr.bf16.gmra.mrb[60].mxu1 %v2221_v16 }
 0x114   :  { %v696_v18 = vpop.f32.mrb[0].mxu0  ;;  %v824_v20 = vpop.f32.mrb[0].mxu1 }
 0x115   :  { %v1153_v21 = vmul.f32 %v2523_v17, %v696_v18  ;;  %v1185_v22 = vmul.f32 %v2523_v17, %v824_v20  ;;  %v698_v23 = vpop.f32.mrb[1].mxu0  ;;  %v826_v24 = vpop.f32.mrb[1].mxu1 }
 0x116   :  { %v699_v25 = vpop.f32.mrb[2].mxu0  ;;  %v827_v26 = vpop.f32.mrb[2].mxu1 }
 0x117   :  { %v1224_v27 = vadd.f32 %v2528_v19, %v1153_v21  ;;  %v1256_v28 = vadd.f32 %v2528_v19, %v1185_v22  ;;  %v1154_v29 = vmul.f32 %v2523_v17, %v699_v25  ;;  %v1186_v30 = vmul.f32 %v2523_v17, %v827_v26  ;;  %v701_v31 = vpop.f32.mrb[3].mxu0  ;;  %v829_v32 = vpop.f32.mrb[3].mxu1 }
 0x119   :  { %v1225_v33 = vadd.f32 %v2528_v19, %v1154_v29  ;;  %v1257_v34 = vadd.f32 %v2528_v19, %v1186_v30  ;;  %v1288_v35 = vmax.f32 %v1224_v27, 0.0  ;;  %v1320_v36 = vmax.f32 %v1256_v28, 0.0 }
 0x11b   :  { %v1289_v37 = vmax.f32 %v1225_v33, 0.0  ;;  %v1321_v38 = vmax.f32 %v1257_v34, 0.0 }
 0x11c   :  { %v704_v39 = vpop.f32.mrb[4].mxu0  ;;  %v832_v40 = vpop.f32.mrb[4].mxu1 }
 0x11d   :  { %v1889_v41 = vpack.c.bf16 %v1289_v37, %v1288_v35  ;;  %v1969_v42 = vpack.c.bf16 %v1321_v38, %v1320_v36  ;;  %v1155_v43 = vmul.f32 %v2523_v17, %v704_v39  ;;  %v1187_v44 = vmul.f32 %v2523_v17, %v832_v40  ;;  %v706_v45 = vpop.f32.mrb[5].mxu0  ;;  %v834_v46 = vpop.f32.mrb[5].mxu1 }
 0x11e   :  { %v707_v47 = vpop.f32.mrb[6].mxu0  ;;  %v835_v48 = vpop.f32.mrb[6].mxu1 }
 0x11f   :  { %1890 = vst [vmem:[%s2758_s4] sm:$0xff] %v1889_v41   ;;  %2061 = vst [vmem:[%s2758_s4 + $0x80] sm:$0xff] %v1969_v42   ;;  %v1226_v49 = vadd.f32 %v2528_v19, %v1155_v43  ;;  %v1258_v50 = vadd.f32 %v2528_v19, %v1187_v44  ;;  %v1156_v51 = vmul.f32 %v2523_v17, %v707_v47  ;;  %v709_v53 = vpop.f32.mrb[7].mxu0  ;;  %v837_v54 = vpop.f32.mrb[7].mxu1 }
 0x120   :  { %v1188_v52 = vmul.f32 %v2523_v17, %v835_v48 }
 0x121   :  { %v1227_v55 = vadd.f32 %v2528_v19, %v1156_v51  ;;  %v1290_v57 = vmax.f32 %v1226_v49, 0.0  ;;  %v1322_v58 = vmax.f32 %v1258_v50, 0.0 }
 0x122   :  { %v1259_v56 = vadd.f32 %v2528_v19, %v1188_v52 }
 0x123   :  { %v1291_v59 = vmax.f32 %v1227_v55, 0.0 }
 0x124   :  { %v1323_v60 = vmax.f32 %v1259_v56, 0.0  ;;  %v712_v61 = vpop.f32.mrb[8].mxu0  ;;  %v840_v62 = vpop.f32.mrb[8].mxu1 }
 0x125   :  { %v1894_v63 = vpack.c.bf16 %v1291_v59, %v1290_v57  ;;  %v1157_v1 = vmul.f32 %v2523_v17, %v712_v61  ;;  %v1189_v2 = vmul.f32 %v2523_v17, %v840_v62  ;;  %v714_v3 = vpop.f32.mrb[9].mxu0  ;;  %v842_v4 = vpop.f32.mrb[9].mxu1 }
 0x126   :  { %v1974_v0 = vpack.c.bf16 %v1323_v60, %v1322_v58  ;;  %v715_v5 = vpop.f32.mrb[10].mxu0  ;;  %v843_v6 = vpop.f32.mrb[10].mxu1 }
 0x127   :  { %2046 = vst [vmem:[%s2758_s4 + $0x8] sm:$0xff] %v1894_v63   ;;  %v1228_v7 = vadd.f32 %v2528_v19, %v1157_v1  ;;  %v1260_v8 = vadd.f32 %v2528_v19, %v1189_v2  ;;  %v1158_v9 = vmul.f32 %v2523_v17, %v715_v5  ;;  %v1190_v10 = vmul.f32 %v2523_v17, %v843_v6  ;;  %v717_v11 = vpop.f32.mrb[11].mxu0  ;;  %v845_v12 = vpop.f32.mrb[11].mxu1 }
 0x128   :  { %2062 = vst [vmem:[%s2758_s4 + $0x88] sm:$0xff] %v1974_v0  }
 0x129   :  { %v1229_v13 = vadd.f32 %v2528_v19, %v1158_v9  ;;  %v1261_v14 = vadd.f32 %v2528_v19, %v1190_v10  ;;  %v1292_v15 = vmax.f32 %v1228_v7, 0.0  ;;  %v1324_v16 = vmax.f32 %v1260_v8, 0.0 }
 0x12b   :  { %v1293_v18 = vmax.f32 %v1229_v13, 0.0  ;;  %v1325_v20 = vmax.f32 %v1261_v14, 0.0 }
 0x12c   :  { %v720_v21 = vpop.f32.mrb[12].mxu0  ;;  %v848_v22 = vpop.f32.mrb[12].mxu1 }
 0x12d   :  { %v1899_v23 = vpack.c.bf16 %v1293_v18, %v1292_v15  ;;  %v1979_v24 = vpack.c.bf16 %v1325_v20, %v1324_v16  ;;  %v1159_v25 = vmul.f32 %v2523_v17, %v720_v21  ;;  %v1191_v26 = vmul.f32 %v2523_v17, %v848_v22  ;;  %v722_v27 = vpop.f32.mrb[13].mxu0  ;;  %v850_v28 = vpop.f32.mrb[13].mxu1 }
 0x12e   :  { %v723_v29 = vpop.f32.mrb[14].mxu0  ;;  %v851_v30 = vpop.f32.mrb[14].mxu1 }
 0x12f   :  { %2047 = vst [vmem:[%s2758_s4 + $0x10] sm:$0xff] %v1899_v23   ;;  %2063 = vst [vmem:[%s2758_s4 + $0x90] sm:$0xff] %v1979_v24   ;;  %v1230_v31 = vadd.f32 %v2528_v19, %v1159_v25  ;;  %v1262_v32 = vadd.f32 %v2528_v19, %v1191_v26  ;;  %v1160_v33 = vmul.f32 %v2523_v17, %v723_v29  ;;  %v725_v35 = vpop.f32.mrb[15].mxu0  ;;  %v853_v36 = vpop.f32.mrb[15].mxu1 }
 0x130   :  { %v1192_v34 = vmul.f32 %v2523_v17, %v851_v30 }
 0x131   :  { %v1231_v37 = vadd.f32 %v2528_v19, %v1160_v33  ;;  %v1294_v39 = vmax.f32 %v1230_v31, 0.0  ;;  %v1326_v40 = vmax.f32 %v1262_v32, 0.0 }
 0x132   :  { %v1263_v38 = vadd.f32 %v2528_v19, %v1192_v34 }
 0x133   :  { %v1295_v41 = vmax.f32 %v1231_v37, 0.0 }
 0x134   :  { %v1327_v42 = vmax.f32 %v1263_v38, 0.0  ;;  %v728_v43 = vpop.f32.mrb[16].mxu0  ;;  %v856_v44 = vpop.f32.mrb[16].mxu1 }
 0x135   :  { %v1904_v45 = vpack.c.bf16 %v1295_v41, %v1294_v39  ;;  %v1161_v47 = vmul.f32 %v2523_v17, %v728_v43  ;;  %v1193_v48 = vmul.f32 %v2523_v17, %v856_v44  ;;  %v730_v49 = vpop.f32.mrb[17].mxu0  ;;  %v858_v50 = vpop.f32.mrb[17].mxu1 }
 0x136   :  { %v1984_v46 = vpack.c.bf16 %v1327_v42, %v1326_v40  ;;  %v731_v51 = vpop.f32.mrb[18].mxu0  ;;  %v859_v52 = vpop.f32.mrb[18].mxu1 }
 0x137   :  { %2048 = vst [vmem:[%s2758_s4 + $0x18] sm:$0xff] %v1904_v45   ;;  %v1232_v53 = vadd.f32 %v2528_v19, %v1161_v47  ;;  %v1264_v54 = vadd.f32 %v2528_v19, %v1193_v48  ;;  %v1162_v55 = vmul.f32 %v2523_v17, %v731_v51  ;;  %v1194_v56 = vmul.f32 %v2523_v17, %v859_v52  ;;  %v733_v57 = vpop.f32.mrb[19].mxu0  ;;  %v861_v58 = vpop.f32.mrb[19].mxu1 }
 0x138   :  { %2064 = vst [vmem:[%s2758_s4 + $0x98] sm:$0xff] %v1984_v46  }
 0x139   :  { %v1233_v59 = vadd.f32 %v2528_v19, %v1162_v55  ;;  %v1265_v60 = vadd.f32 %v2528_v19, %v1194_v56  ;;  %v1296_v61 = vmax.f32 %v1232_v53, 0.0  ;;  %v1328_v62 = vmax.f32 %v1264_v54, 0.0 }
 0x13b   :  { %v1297_v63 = vmax.f32 %v1233_v59, 0.0  ;;  %v1329_v0 = vmax.f32 %v1265_v60, 0.0 }
 0x13c   :  { %v736_v1 = vpop.f32.mrb[20].mxu0  ;;  %v864_v2 = vpop.f32.mrb[20].mxu1 }
 0x13d   :  { %v1909_v3 = vpack.c.bf16 %v1297_v63, %v1296_v61  ;;  %v1989_v4 = vpack.c.bf16 %v1329_v0, %v1328_v62  ;;  %v1163_v5 = vmul.f32 %v2523_v17, %v736_v1  ;;  %v1195_v6 = vmul.f32 %v2523_v17, %v864_v2  ;;  %v738_v7 = vpop.f32.mrb[21].mxu0  ;;  %v866_v8 = vpop.f32.mrb[21].mxu1 }
 0x13e   :  { %v739_v9 = vpop.f32.mrb[22].mxu0  ;;  %v867_v10 = vpop.f32.mrb[22].mxu1 }
 0x13f   :  { %2049 = vst [vmem:[%s2758_s4 + $0x20] sm:$0xff] %v1909_v3   ;;  %2065 = vst [vmem:[%s2758_s4 + $0xa0] sm:$0xff] %v1989_v4   ;;  %v1234_v11 = vadd.f32 %v2528_v19, %v1163_v5  ;;  %v1266_v12 = vadd.f32 %v2528_v19, %v1195_v6  ;;  %v1164_v13 = vmul.f32 %v2523_v17, %v739_v9  ;;  %v741_v15 = vpop.f32.mrb[23].mxu0  ;;  %v869_v16 = vpop.f32.mrb[23].mxu1 }
 0x140   :  { %v1196_v14 = vmul.f32 %v2523_v17, %v867_v10 }
 0x141   :  { %v1235_v18 = vadd.f32 %v2528_v19, %v1164_v13  ;;  %v1298_v21 = vmax.f32 %v1234_v11, 0.0  ;;  %v1330_v22 = vmax.f32 %v1266_v12, 0.0 }
 0x142   :  { %v1267_v20 = vadd.f32 %v2528_v19, %v1196_v14 }
 0x143   :  { %v1299_v23 = vmax.f32 %v1235_v18, 0.0 }
 0x144   :  { %v1331_v24 = vmax.f32 %v1267_v20, 0.0  ;;  %v744_v25 = vpop.f32.mrb[24].mxu0  ;;  %v872_v26 = vpop.f32.mrb[24].mxu1 }
 0x145   :  { %v1914_v27 = vpack.c.bf16 %v1299_v23, %v1298_v21  ;;  %v1165_v29 = vmul.f32 %v2523_v17, %v744_v25  ;;  %v1197_v30 = vmul.f32 %v2523_v17, %v872_v26  ;;  %v746_v31 = vpop.f32.mrb[25].mxu0  ;;  %v874_v32 = vpop.f32.mrb[25].mxu1 }
 0x146   :  { %v1994_v28 = vpack.c.bf16 %v1331_v24, %v1330_v22  ;;  %v747_v33 = vpop.f32.mrb[26].mxu0  ;;  %v875_v34 = vpop.f32.mrb[26].mxu1 }
 0x147   :  { %2050 = vst [vmem:[%s2758_s4 + $0x28] sm:$0xff] %v1914_v27   ;;  %v1236_v35 = vadd.f32 %v2528_v19, %v1165_v29  ;;  %v1268_v36 = vadd.f32 %v2528_v19, %v1197_v30  ;;  %v1166_v37 = vmul.f32 %v2523_v17, %v747_v33  ;;  %v1198_v38 = vmul.f32 %v2523_v17, %v875_v34  ;;  %v749_v39 = vpop.f32.mrb[27].mxu0  ;;  %v877_v40 = vpop.f32.mrb[27].mxu1 }
 0x148   :  { %2066 = vst [vmem:[%s2758_s4 + $0xa8] sm:$0xff] %v1994_v28  }
 0x149   :  { %v1237_v41 = vadd.f32 %v2528_v19, %v1166_v37  ;;  %v1269_v42 = vadd.f32 %v2528_v19, %v1198_v38  ;;  %v1300_v43 = vmax.f32 %v1236_v35, 0.0  ;;  %v1332_v44 = vmax.f32 %v1268_v36, 0.0 }
 0x14b   :  { %v1301_v45 = vmax.f32 %v1237_v41, 0.0  ;;  %v1333_v46 = vmax.f32 %v1269_v42, 0.0 }
 0x14c   :  { %v752_v47 = vpop.f32.mrb[28].mxu0  ;;  %v880_v48 = vpop.f32.mrb[28].mxu1 }
 0x14d   :  { %v1919_v49 = vpack.c.bf16 %v1301_v45, %v1300_v43  ;;  %v1999_v50 = vpack.c.bf16 %v1333_v46, %v1332_v44  ;;  %v1167_v51 = vmul.f32 %v2523_v17, %v752_v47  ;;  %v1199_v52 = vmul.f32 %v2523_v17, %v880_v48  ;;  %v754_v53 = vpop.f32.mrb[29].mxu0  ;;  %v882_v54 = vpop.f32.mrb[29].mxu1 }
 0x14e   :  { %v755_v55 = vpop.f32.mrb[30].mxu0  ;;  %v883_v56 = vpop.f32.mrb[30].mxu1 }
 0x14f   :  { %2051 = vst [vmem:[%s2758_s4 + $0x30] sm:$0xff] %v1919_v49   ;;  %2067 = vst [vmem:[%s2758_s4 + $0xb0] sm:$0xff] %v1999_v50   ;;  %v1238_v57 = vadd.f32 %v2528_v19, %v1167_v51  ;;  %v1270_v58 = vadd.f32 %v2528_v19, %v1199_v52  ;;  %v1168_v59 = vmul.f32 %v2523_v17, %v755_v55  ;;  %v757_v61 = vpop.f32.mrb[31].mxu0  ;;  %v885_v62 = vpop.f32.mrb[31].mxu1 }
 0x150   :  { %v1200_v60 = vmul.f32 %v2523_v17, %v883_v56 }
 0x151   :  { %v1239_v63 = vadd.f32 %v2528_v19, %v1168_v59  ;;  %v1302_v1 = vmax.f32 %v1238_v57, 0.0  ;;  %v1334_v2 = vmax.f32 %v1270_v58, 0.0 }
 0x152   :  { %v1271_v0 = vadd.f32 %v2528_v19, %v1200_v60 }
 0x153   :  { %v1303_v3 = vmax.f32 %v1239_v63, 0.0 }
 0x154   :  { %v1335_v4 = vmax.f32 %v1271_v0, 0.0  ;;  %v760_v5 = vpop.f32.mrb[32].mxu0  ;;  %v888_v6 = vpop.f32.mrb[32].mxu1 }
 0x155   :  { %v1924_v7 = vpack.c.bf16 %v1303_v3, %v1302_v1  ;;  %v1169_v9 = vmul.f32 %v2523_v17, %v760_v5  ;;  %v1201_v10 = vmul.f32 %v2523_v17, %v888_v6  ;;  %v762_v11 = vpop.f32.mrb[33].mxu0  ;;  %v890_v12 = vpop.f32.mrb[33].mxu1 }
 0x156   :  { %v2004_v8 = vpack.c.bf16 %v1335_v4, %v1334_v2  ;;  %v763_v13 = vpop.f32.mrb[34].mxu0  ;;  %v891_v14 = vpop.f32.mrb[34].mxu1 }
 0x157   :  { %2052 = vst [vmem:[%s2758_s4 + $0x38] sm:$0xff] %v1924_v7   ;;  %v1240_v15 = vadd.f32 %v2528_v19, %v1169_v9  ;;  %v1272_v16 = vadd.f32 %v2528_v19, %v1201_v10  ;;  %v1170_v18 = vmul.f32 %v2523_v17, %v763_v13  ;;  %v1202_v20 = vmul.f32 %v2523_v17, %v891_v14  ;;  %v765_v21 = vpop.f32.mrb[35].mxu0  ;;  %v893_v22 = vpop.f32.mrb[35].mxu1 }
 0x158   :  { %2068 = vst [vmem:[%s2758_s4 + $0xb8] sm:$0xff] %v2004_v8  }
 0x159   :  { %v1241_v23 = vadd.f32 %v2528_v19, %v1170_v18  ;;  %v1273_v24 = vadd.f32 %v2528_v19, %v1202_v20  ;;  %v1304_v25 = vmax.f32 %v1240_v15, 0.0  ;;  %v1336_v26 = vmax.f32 %v1272_v16, 0.0 }
 0x15b   :  { %v1305_v27 = vmax.f32 %v1241_v23, 0.0  ;;  %v1337_v28 = vmax.f32 %v1273_v24, 0.0 }
 0x15c   :  { %v768_v29 = vpop.f32.mrb[36].mxu0  ;;  %v896_v30 = vpop.f32.mrb[36].mxu1 }
 0x15d   :  { %v1929_v31 = vpack.c.bf16 %v1305_v27, %v1304_v25  ;;  %v2009_v32 = vpack.c.bf16 %v1337_v28, %v1336_v26  ;;  %v1171_v33 = vmul.f32 %v2523_v17, %v768_v29  ;;  %v1203_v34 = vmul.f32 %v2523_v17, %v896_v30  ;;  %v770_v35 = vpop.f32.mrb[37].mxu0  ;;  %v898_v36 = vpop.f32.mrb[37].mxu1 }
 0x15e   :  { %v771_v37 = vpop.f32.mrb[38].mxu0  ;;  %v899_v38 = vpop.f32.mrb[38].mxu1 }
 0x15f   :  { %2053 = vst [vmem:[%s2758_s4 + $0x40] sm:$0xff] %v1929_v31   ;;  %2069 = vst [vmem:[%s2758_s4 + $0xc0] sm:$0xff] %v2009_v32   ;;  %v1242_v39 = vadd.f32 %v2528_v19, %v1171_v33  ;;  %v1274_v40 = vadd.f32 %v2528_v19, %v1203_v34  ;;  %v1172_v41 = vmul.f32 %v2523_v17, %v771_v37  ;;  %v773_v43 = vpop.f32.mrb[39].mxu0  ;;  %v901_v44 = vpop.f32.mrb[39].mxu1 }
 0x160   :  { %v1204_v42 = vmul.f32 %v2523_v17, %v899_v38 }
 0x161   :  { %v1243_v45 = vadd.f32 %v2528_v19, %v1172_v41  ;;  %v1306_v47 = vmax.f32 %v1242_v39, 0.0  ;;  %v1338_v48 = vmax.f32 %v1274_v40, 0.0 }
 0x162   :  { %v1275_v46 = vadd.f32 %v2528_v19, %v1204_v42 }
 0x163   :  { %v1307_v49 = vmax.f32 %v1243_v45, 0.0 }
 0x164   :  { %v1339_v50 = vmax.f32 %v1275_v46, 0.0  ;;  %v776_v51 = vpop.f32.mrb[40].mxu0  ;;  %v904_v52 = vpop.f32.mrb[40].mxu1 }
 0x165   :  { %v1934_v53 = vpack.c.bf16 %v1307_v49, %v1306_v47  ;;  %v1173_v55 = vmul.f32 %v2523_v17, %v776_v51  ;;  %v1205_v56 = vmul.f32 %v2523_v17, %v904_v52  ;;  %v778_v57 = vpop.f32.mrb[41].mxu0  ;;  %v906_v58 = vpop.f32.mrb[41].mxu1 }
 0x166   :  { %v2014_v54 = vpack.c.bf16 %v1339_v50, %v1338_v48  ;;  %v779_v59 = vpop.f32.mrb[42].mxu0  ;;  %v907_v60 = vpop.f32.mrb[42].mxu1 }
 0x167   :  { %2054 = vst [vmem:[%s2758_s4 + $0x48] sm:$0xff] %v1934_v53   ;;  %v1244_v61 = vadd.f32 %v2528_v19, %v1173_v55  ;;  %v1276_v62 = vadd.f32 %v2528_v19, %v1205_v56  ;;  %v1174_v63 = vmul.f32 %v2523_v17, %v779_v59  ;;  %v1206_v0 = vmul.f32 %v2523_v17, %v907_v60  ;;  %v781_v1 = vpop.f32.mrb[43].mxu0  ;;  %v909_v2 = vpop.f32.mrb[43].mxu1 }
 0x168   :  { %2070 = vst [vmem:[%s2758_s4 + $0xc8] sm:$0xff] %v2014_v54  }
 0x169   :  { %v1245_v3 = vadd.f32 %v2528_v19, %v1174_v63  ;;  %v1277_v4 = vadd.f32 %v2528_v19, %v1206_v0  ;;  %v1308_v5 = vmax.f32 %v1244_v61, 0.0  ;;  %v1340_v6 = vmax.f32 %v1276_v62, 0.0 }
 0x16b   :  { %v1309_v7 = vmax.f32 %v1245_v3, 0.0  ;;  %v1341_v8 = vmax.f32 %v1277_v4, 0.0 }
 0x16c   :  { %v784_v9 = vpop.f32.mrb[44].mxu0  ;;  %v912_v10 = vpop.f32.mrb[44].mxu1 }
 0x16d   :  { %v1939_v11 = vpack.c.bf16 %v1309_v7, %v1308_v5  ;;  %v2019_v12 = vpack.c.bf16 %v1341_v8, %v1340_v6  ;;  %v1175_v13 = vmul.f32 %v2523_v17, %v784_v9  ;;  %v1207_v14 = vmul.f32 %v2523_v17, %v912_v10  ;;  %v786_v15 = vpop.f32.mrb[45].mxu0  ;;  %v914_v16 = vpop.f32.mrb[45].mxu1 }
 0x16e   :  { %v787_v18 = vpop.f32.mrb[46].mxu0  ;;  %v915_v20 = vpop.f32.mrb[46].mxu1 }
 0x16f   :  { %2055 = vst [vmem:[%s2758_s4 + $0x50] sm:$0xff] %v1939_v11   ;;  %2071 = vst [vmem:[%s2758_s4 + $0xd0] sm:$0xff] %v2019_v12   ;;  %v1246_v21 = vadd.f32 %v2528_v19, %v1175_v13  ;;  %v1278_v22 = vadd.f32 %v2528_v19, %v1207_v14  ;;  %v1176_v23 = vmul.f32 %v2523_v17, %v787_v18  ;;  %v789_v25 = vpop.f32.mrb[47].mxu0  ;;  %v917_v26 = vpop.f32.mrb[47].mxu1 }
 0x170   :  { %v1208_v24 = vmul.f32 %v2523_v17, %v915_v20 }
 0x171   :  { %v1247_v27 = vadd.f32 %v2528_v19, %v1176_v23  ;;  %v1310_v29 = vmax.f32 %v1246_v21, 0.0  ;;  %v1342_v30 = vmax.f32 %v1278_v22, 0.0 }
 0x172   :  { %v1279_v28 = vadd.f32 %v2528_v19, %v1208_v24 }
 0x173   :  { %v1311_v31 = vmax.f32 %v1247_v27, 0.0 }
 0x174   :  { %v1343_v32 = vmax.f32 %v1279_v28, 0.0  ;;  %v792_v33 = vpop.f32.mrb[48].mxu0  ;;  %v920_v34 = vpop.f32.mrb[48].mxu1 }
 0x175   :  { %v1944_v35 = vpack.c.bf16 %v1311_v31, %v1310_v29  ;;  %v1177_v37 = vmul.f32 %v2523_v17, %v792_v33  ;;  %v1209_v38 = vmul.f32 %v2523_v17, %v920_v34  ;;  %v794_v39 = vpop.f32.mrb[49].mxu0  ;;  %v922_v40 = vpop.f32.mrb[49].mxu1 }
 0x176   :  { %v2024_v36 = vpack.c.bf16 %v1343_v32, %v1342_v30  ;;  %v795_v41 = vpop.f32.mrb[50].mxu0  ;;  %v923_v42 = vpop.f32.mrb[50].mxu1 }
 0x177   :  { %2056 = vst [vmem:[%s2758_s4 + $0x58] sm:$0xff] %v1944_v35   ;;  %v1248_v43 = vadd.f32 %v2528_v19, %v1177_v37  ;;  %v1280_v44 = vadd.f32 %v2528_v19, %v1209_v38  ;;  %v1178_v45 = vmul.f32 %v2523_v17, %v795_v41  ;;  %v1210_v46 = vmul.f32 %v2523_v17, %v923_v42  ;;  %v797_v47 = vpop.f32.mrb[51].mxu0  ;;  %v925_v48 = vpop.f32.mrb[51].mxu1 }
 0x178   :  { %2072 = vst [vmem:[%s2758_s4 + $0xd8] sm:$0xff] %v2024_v36  }
 0x179   :  { %v1249_v49 = vadd.f32 %v2528_v19, %v1178_v45  ;;  %v1281_v50 = vadd.f32 %v2528_v19, %v1210_v46  ;;  %v1312_v51 = vmax.f32 %v1248_v43, 0.0  ;;  %v1344_v52 = vmax.f32 %v1280_v44, 0.0 }
 0x17b   :  { %v1313_v53 = vmax.f32 %v1249_v49, 0.0  ;;  %v1345_v54 = vmax.f32 %v1281_v50, 0.0 }
 0x17c   :  { %v800_v55 = vpop.f32.mrb[52].mxu0  ;;  %v928_v56 = vpop.f32.mrb[52].mxu1 }
 0x17d   :  { %v1949_v57 = vpack.c.bf16 %v1313_v53, %v1312_v51  ;;  %v2029_v58 = vpack.c.bf16 %v1345_v54, %v1344_v52  ;;  %v1179_v59 = vmul.f32 %v2523_v17, %v800_v55  ;;  %v1211_v60 = vmul.f32 %v2523_v17, %v928_v56  ;;  %v802_v61 = vpop.f32.mrb[53].mxu0  ;;  %v930_v62 = vpop.f32.mrb[53].mxu1 }
 0x17e   :  { %v803_v63 = vpop.f32.mrb[54].mxu0  ;;  %v931_v0 = vpop.f32.mrb[54].mxu1 }
 0x17f   :  { %2057 = vst [vmem:[%s2758_s4 + $0x60] sm:$0xff] %v1949_v57   ;;  %2073 = vst [vmem:[%s2758_s4 + $0xe0] sm:$0xff] %v2029_v58   ;;  %v1250_v1 = vadd.f32 %v2528_v19, %v1179_v59  ;;  %v1282_v2 = vadd.f32 %v2528_v19, %v1211_v60  ;;  %v1180_v3 = vmul.f32 %v2523_v17, %v803_v63  ;;  %v805_v5 = vpop.f32.mrb[55].mxu0  ;;  %v933_v6 = vpop.f32.mrb[55].mxu1 }
 0x180   :  { %v1212_v4 = vmul.f32 %v2523_v17, %v931_v0 }
 0x181   :  { %v1251_v7 = vadd.f32 %v2528_v19, %v1180_v3  ;;  %v1314_v9 = vmax.f32 %v1250_v1, 0.0  ;;  %v1346_v10 = vmax.f32 %v1282_v2, 0.0 }
 0x182   :  { %v1283_v8 = vadd.f32 %v2528_v19, %v1212_v4 }
 0x183   :  { %v1315_v11 = vmax.f32 %v1251_v7, 0.0 }
 0x184   :  { %v1347_v12 = vmax.f32 %v1283_v8, 0.0  ;;  %v808_v13 = vpop.f32.mrb[56].mxu0  ;;  %v936_v14 = vpop.f32.mrb[56].mxu1 }
 0x185   :  { %v1954_v15 = vpack.c.bf16 %v1315_v11, %v1314_v9  ;;  %v1181_v18 = vmul.f32 %v2523_v17, %v808_v13  ;;  %v1213_v20 = vmul.f32 %v2523_v17, %v936_v14  ;;  %v810_v21 = vpop.f32.mrb[57].mxu0  ;;  %v938_v22 = vpop.f32.mrb[57].mxu1 }
 0x186   :  { %v2034_v16 = vpack.c.bf16 %v1347_v12, %v1346_v10  ;;  %v811_v23 = vpop.f32.mrb[58].mxu0  ;;  %v939_v24 = vpop.f32.mrb[58].mxu1 }
 0x187   :  { %2058 = vst [vmem:[%s2758_s4 + $0x68] sm:$0xff] %v1954_v15   ;;  %v1252_v25 = vadd.f32 %v2528_v19, %v1181_v18  ;;  %v1284_v26 = vadd.f32 %v2528_v19, %v1213_v20  ;;  %v1182_v27 = vmul.f32 %v2523_v17, %v811_v23  ;;  %v1214_v28 = vmul.f32 %v2523_v17, %v939_v24  ;;  %v813_v29 = vpop.f32.mrb[59].mxu0  ;;  %v941_v30 = vpop.f32.mrb[59].mxu1 }
 0x188   :  { %2074 = vst [vmem:[%s2758_s4 + $0xe8] sm:$0xff] %v2034_v16  }
 0x189   :  { %v1253_v31 = vadd.f32 %v2528_v19, %v1182_v27  ;;  %v1285_v32 = vadd.f32 %v2528_v19, %v1214_v28  ;;  %v1316_v33 = vmax.f32 %v1252_v25, 0.0  ;;  %v1348_v34 = vmax.f32 %v1284_v26, 0.0 }
 0x18b   :  { %v1317_v35 = vmax.f32 %v1253_v31, 0.0  ;;  %v1349_v36 = vmax.f32 %v1285_v32, 0.0 }
 0x18c   :  { %v816_v37 = vpop.f32.mrb[60].mxu0  ;;  %v944_v38 = vpop.f32.mrb[60].mxu1 }
 0x18d   :  { %v1959_v39 = vpack.c.bf16 %v1317_v35, %v1316_v33  ;;  %v2039_v40 = vpack.c.bf16 %v1349_v36, %v1348_v34  ;;  %v1183_v41 = vmul.f32 %v2523_v17, %v816_v37  ;;  %v1215_v42 = vmul.f32 %v2523_v17, %v944_v38  ;;  %v818_v43 = vpop.f32.mrb[61].mxu0  ;;  %v946_v44 = vpop.f32.mrb[61].mxu1 }
 0x18e   :  { %v819_v45 = vpop.f32.mrb[62].mxu0  ;;  %v947_v46 = vpop.f32.mrb[62].mxu1 }
 0x18f   :  { %2059 = vst [vmem:[%s2758_s4 + $0x70] sm:$0xff] %v1959_v39   ;;  %2075 = vst [vmem:[%s2758_s4 + $0xf0] sm:$0xff] %v2039_v40   ;;  %v1254_v47 = vadd.f32 %v2528_v19, %v1183_v41  ;;  %v1286_v48 = vadd.f32 %v2528_v19, %v1215_v42  ;;  %v1184_v49 = vmul.f32 %v2523_v17, %v819_v45  ;;  %v821_v51 = vpop.f32.mrb[63].mxu0  ;;  %v949_v52 = vpop.f32.mrb[63].mxu1 }
 0x190   :  { %v1216_v50 = vmul.f32 %v2523_v17, %v947_v46 }
 0x191   :  { %v1255_v53 = vadd.f32 %v2528_v19, %v1184_v49  ;;  %v1318_v55 = vmax.f32 %v1254_v47, 0.0  ;;  %v1350_v56 = vmax.f32 %v1286_v48, 0.0 }
 0x192   :  { %v1287_v54 = vadd.f32 %v2528_v19, %v1216_v50 }
 0x193   :  { %v1319_v57 = vmax.f32 %v1255_v53, 0.0 }
 0x194   :  { %v1351_v58 = vmax.f32 %v1287_v54, 0.0 }
 0x195   :  { %v1964_v59 = vpack.c.bf16 %v1319_v57, %v1318_v55 }
 0x196   :  { %v2044_v60 = vpack.c.bf16 %v1351_v58, %v1350_v56 }
 0x197   :  { %2060 = vst [vmem:[%s2758_s4 + $0x78] sm:$0xff] %v1964_v59  }
 0x198   :  { %2076 = vst [vmem:[%s2758_s4 + $0xf8] sm:$0xff] %v2044_v60  }

</bundles_post_ra>
